<compile_context>
chip_gen: v7x
topology: tpu7x:2x2x1
jax: 0.10.0
libtpu: 0.0.40
codegen_flags: <defaults>
</compile_context>

<pallas_src>
import functools

import jax
import jax.numpy as jnp
from jax.experimental import pallas as pl
from jax.experimental.pallas import tpu as pltpu

EPSILON = 1e-5
_LANE = 128
_FAST_PATH_BYTES = 256 * 1024        # below this, skip the kernel entirely


def dc_loss_ref(output, target):
    """Pure-jnp reference (also used as the tiny-input fast path)."""
    B = output.shape[0]
    o = output.reshape(B, -1).astype(jnp.float32)
    t = target.reshape(B, -1).astype(jnp.float32)
    loss = jnp.mean(jnp.square(jnp.mean(t, 0) - jnp.mean(o, 0)))
    energy = jnp.mean(jnp.square(t)) + EPSILON
    return loss / energy


def _dc_loss_kernel(pred_ref, tgt_ref, num_ref, eng_ref, *,
                    tiles_per_core, n_tiles, tile_f, rem, gated):
    """Accumulate per-lane partial sums into per-core VMEM-resident outputs.

    pred_ref, tgt_ref : (B, tile_f) input tiles (original dtype)
    num_ref           : (1, 1, tile_f) f32 accumulator of (sum_b(t - o))^2 per feature
    eng_ref           : (1, 1, tile_f) f32 accumulator of sum_b(t^2)      per feature
    """
    i = pl.program_id(1)

    @pl.when(i == 0)
    def _init():
        num_ref[...] = jnp.zeros_like(num_ref)
        eng_ref[...] = jnp.zeros_like(eng_ref)

    g = pl.program_id(0) * tiles_per_core + i          # global F-tile index

    def _accumulate():
        p = pred_ref[...].astype(jnp.float32)
        t = tgt_ref[...].astype(jnp.float32)
        d = t - p
        tt = t * t
        if rem != 0:
            # The last real tile reads past the (unpadded) array end; Pallas does
            # not zero-fill those lanes, so mask them out of both partial sums.
            lane = jax.lax.broadcasted_iota(jnp.int32, (1, tile_f), 1)
            valid = jnp.logical_or(g < n_tiles - 1, lane < rem)
            d = jnp.where(valid, d, 0.0)
            tt = jnp.where(valid, tt, 0.0)
        # Sublane (batch) reductions land on the XLU, idle in this kernel.
        s = jnp.sum(d, axis=0, keepdims=True)           # (1, tile_f)
        num_ref[...] += (s * s).reshape(1, 1, tile_f)
        eng_ref[...] += jnp.sum(tt, axis=0, keepdims=True).reshape(1, 1, tile_f)

    if gated:
        # Uneven 2-core split: skip the phantom tile(s) of the last core.
        pl.when(g < n_tiles)(_accumulate)
    else:
        _accumulate()


def _choose_tiling(B, F, itemsize, max_tile_f=None):
    """Pick tile_f by bytes and return (tile_f, vmem_limit_bytes)."""
    target_block_bytes = 4 << 20     # ~4 MiB per input block -> HBM roofline on v5e/v6e/v7x
    live_budget_bytes = 36 << 20     # total live VMEM target (v7x: 64 MiB physical per TC)
    # Live bytes per lane-column of tile_f:
    #   2 inputs x 2 pipeline buffers x B x itemsize     (streamed input blocks)
    # + ~3 x B x 4                                       (f32 cast / diff / square temporaries)
    # + 2 outputs x 2 buffers x 4                        (two (1, tile_f) f32 accumulators)
    per_lane = 4 * B * itemsize + 12 * B + 16

    tile = max(_LANE, target_block_bytes // (B * itemsize))
    tile = min(tile, max(_LANE, live_budget_bytes // per_lane))
    f_ceil = ((F + _LANE - 1) // _LANE) * _LANE
    tile = min(tile, f_ceil)
    if max_tile_f is not None:
        tile = min(tile, max(_LANE, max_tile_f))
    tile = max(_LANE, (tile // _LANE) * _LANE)

    est_live = per_lane * tile
    vmem_limit = max(48 << 20, (est_live * 5) // 4)
    # TODO(synk): for extreme batch sizes (per-lane live bytes too large even at
    # tile_f=128) add an inner B-tiled "arbitrary" grid axis instead of relying
    # on a raised vmem_limit_bytes.
    return tile, vmem_limit


def dc_loss(output, target, *, force_pallas=False, max_tile_f=None):
    """DCLoss forward. output/target: (B, ...) arrays; returns scalar f32."""
    assert output.shape == target.shape
    B = output.shape[0]
    pred2d = output.reshape(B, -1)       # original dtype end-to-end; f32 cast in-kernel
    tgt2d = target.reshape(B, -1)
    F = pred2d.shape[1]

    total_bytes = 2 * B * F * pred2d.dtype.itemsize
    if not force_pallas and total_bytes < _FAST_PATH_BYTES:
        # Kernel-launch + grid + epilogue overhead dominates at this size.
        return dc_loss_ref(output, target)

    tile_f, vmem_limit = _choose_tiling(B, F, pred2d.dtype.itemsize, max_tile_f)
    n_tiles = -(-F // tile_f)            # cdiv
    rem = F % tile_f

    # v7x: split the F-tile range across the two TensorCores via a leading
    # "parallel" axis; harmless sequential loop on single-TC v5e/v6e.
    n_splits = 2 if n_tiles >= 2 else 1
    tiles_per_core = -(-n_tiles // n_splits)
    gated = n_splits * tiles_per_core != n_tiles

    def in_map(c, i):
        g = c * tiles_per_core + i
        if gated:
            g = jnp.minimum(g, n_tiles - 1)   # clamp phantom tiles (skipped in-kernel)
        return (0, g)

    kernel = functools.partial(
        _dc_loss_kernel,
        tiles_per_core=tiles_per_core, n_tiles=n_tiles,
        tile_f=tile_f, rem=rem, gated=gated)

    num_partial, eng_partial = pl.pallas_call(
        kernel,
        out_shape=(
            jax.ShapeDtypeStruct((n_splits, 1, tile_f), jnp.float32),
            jax.ShapeDtypeStruct((n_splits, 1, tile_f), jnp.float32),
        ),
        grid_spec=pltpu.PrefetchScalarGridSpec(
            num_scalar_prefetch=0,
            grid=(n_splits, tiles_per_core),
            in_specs=[
                pl.BlockSpec((B, tile_f), in_map),
                pl.BlockSpec((B, tile_f), in_map),
            ],
            out_specs=(
                pl.BlockSpec((1, 1, tile_f), lambda c, i: (c, 0, 0)),
                pl.BlockSpec((1, 1, tile_f), lambda c, i: (c, 0, 0)),
            ),
        ),
        compiler_params=pltpu.CompilerParams(
            dimension_semantics=("parallel", "arbitrary"),
            vmem_limit_bytes=vmem_limit,
        ),
    )(pred2d, tgt2d)

    # Tiny epilogue: final cross-lane reductions + scalar normalization with the
    # TRUE feature count (masked tail lanes contributed nothing).
    num_sum = jnp.sum(num_partial)       # sum_f (sum_b(t - o))^2
    eng_sum = jnp.sum(eng_partial)       # sum_{b,f} t^2
    b = jnp.float32(B)
    f = jnp.float32(F)
    return (num_sum / (b * b * f)) / (eng_sum / (b * f) + jnp.float32(EPSILON))


if __name__ == "__main__":
    key = jax.random.PRNGKey(0)
    k1, k2, k3, k4 = jax.random.split(key, 4)

    # (B, C, H, W) conv-style shape; F = 1024 -> single tile, no masking.
    out1 = jax.random.normal(k1, (2, 4, 16, 16), dtype=jnp.float32)
    tgt1 = jax.random.normal(k2, (2, 4, 16, 16), dtype=jnp.float32)
    got1 = jax.block_until_ready(dc_loss(out1, tgt1, force_pallas=True))
    ref1 = dc_loss_ref(out1, tgt1)
    assert jnp.allclose(got1, ref1, rtol=1e-5, atol=1e-6), (got1, ref1)

    # Default entry: tiny input takes the fused-XLA fast path.
    got1_fast = jax.block_until_ready(dc_loss(out1, tgt1))
    assert jnp.allclose(got1_fast, ref1, rtol=1e-5, atol=1e-6), (got1_fast, ref1)

    # Non-128-multiple feature count (F = 300) -> exercises in-kernel tail masking.
    out2 = jax.random.normal(k3, (2, 3, 10, 10), dtype=jnp.float32)
    tgt2 = jax.random.normal(k4, (2, 3, 10, 10), dtype=jnp.float32)
    got2 = jax.block_until_ready(dc_loss(out2, tgt2, force_pallas=True))
    ref2 = dc_loss_ref(out2, tgt2)
    assert jnp.allclose(got2, ref2, rtol=1e-5, atol=1e-6), (got2, ref2)

    # Multi-tile + uneven 2-way core split + tail mask (small max_tile_f forces
    # several grid steps at demo-sized inputs): F = 4600 -> 9 tiles of 512.
    k5, k6 = jax.random.split(k3)
    out3 = jax.random.normal(k5, (2, 4600), dtype=jnp.float32)
    tgt3 = jax.random.normal(k6, (2, 4600), dtype=jnp.float32)
    got3 = jax.block_until_ready(dc_loss(out3, tgt3, force_pallas=True, max_tile_f=512))
    ref3 = dc_loss_ref(out3, tgt3)
    assert jnp.allclose(got3, ref3, rtol=1e-5, atol=1e-6), (got3, ref3)

    print("KERNEL_OK")
</pallas_src>

<mosaic_0001>
module attributes {stable_mosaic.version = 11 : i64} {
  func.func @_dc_loss_kernel(%arg0: i32, %arg1: i32, %arg2: memref<2x1024xf32, #tpu.memory_space<vmem>>, %arg3: memref<2x1024xf32, #tpu.memory_space<vmem>>, %arg4: memref<1x1x1024xf32, #tpu.memory_space<vmem>>, %arg5: memref<1x1x1024xf32, #tpu.memory_space<vmem>>) attributes {dimension_semantics = [#tpu.dimension_semantics<parallel>, #tpu.dimension_semantics<arbitrary>], iteration_bounds = array<i64: 1, 1>, scalar_prefetch = 0 : i64, scratch_operands = 0 : i64, tpu.core_type = #tpu.core_type<tc>, window_params = [{transform_indices = @transform_0, window_bounds = array<i64: 2, 1024>}, {transform_indices = @transform_1, window_bounds = array<i64: 2, 1024>}, {transform_indices = @transform_2, window_bounds = array<i64: 1, 1, 1024>}, {transform_indices = @transform_3, window_bounds = array<i64: 1, 1, 1024>}]} {
    %c0_i32 = arith.constant 0 : i32
    %0 = arith.cmpi eq, %arg1, %c0_i32 : i32
    %1 = arith.extui %0 : i1 to i32
    %c0_i32_0 = arith.constant 0 : i32
    %2 = arith.cmpi ne, %1, %c0_i32_0 : i32
    scf.if %2 {
      %cst_17 = arith.constant 0.000000e+00 : f32
      %20 = vector.broadcast %cst_17 : f32 to vector<1x1x1024xf32>
      %c0_18 = arith.constant 0 : index
      %c0_19 = arith.constant 0 : index
      %c0_20 = arith.constant 0 : index
      %21 = vector.load %arg4[%c0_18, %c0_19, %c0_20] : memref<1x1x1024xf32, #tpu.memory_space<vmem>>, vector<1x1x1024xf32>
      tpu.vector_store %arg4[%c0_18, %c0_19, %c0_20], %20 {strides = array<i32>} : memref<1x1x1024xf32, #tpu.memory_space<vmem>>, vector<1x1x1024xf32>,
      %cst_21 = arith.constant 0.000000e+00 : f32
      %22 = vector.broadcast %cst_21 : f32 to vector<1x1x1024xf32>
      %c0_22 = arith.constant 0 : index
      %c0_23 = arith.constant 0 : index
      %c0_24 = arith.constant 0 : index
      %23 = vector.load %arg5[%c0_22, %c0_23, %c0_24] : memref<1x1x1024xf32, #tpu.memory_space<vmem>>, vector<1x1x1024xf32>
      tpu.vector_store %arg5[%c0_22, %c0_23, %c0_24], %22 {strides = array<i32>} : memref<1x1x1024xf32, #tpu.memory_space<vmem>>, vector<1x1x1024xf32>,
    } else {
    }
    %c0 = arith.constant 0 : index
    %c0_1 = arith.constant 0 : index
    %3 = vector.load %arg2[%c0, %c0_1] : memref<2x1024xf32, #tpu.memory_space<vmem>>, vector<2x1024xf32>
    %c0_2 = arith.constant 0 : index
    %c0_3 = arith.constant 0 : index
    %4 = vector.load %arg3[%c0_2, %c0_3] : memref<2x1024xf32, #tpu.memory_space<vmem>>, vector<2x1024xf32>
    %5 = arith.subf %4, %3 : vector<2x1024xf32>
    %6 = arith.mulf %4, %4 : vector<2x1024xf32>
    %cst = arith.constant dense<0.000000e+00> : vector<1024xf32>
    %7 = vector.multi_reduction <add>, %5, %cst [0] : vector<2x1024xf32> to vector<1024xf32>
    %8 = vector.shape_cast %7 : vector<1024xf32> to vector<1x1024xf32>
    %c0_4 = arith.constant 0 : index
    %c0_5 = arith.constant 0 : index
    %c0_6 = arith.constant 0 : index
    %9 = vector.load %arg4[%c0_4, %c0_5, %c0_6] : memref<1x1x1024xf32, #tpu.memory_space<vmem>>, vector<1x1x1024xf32>
    %10 = arith.mulf %8, %8 : vector<1x1024xf32>
    %11 = vector.shape_cast %10 : vector<1x1024xf32> to vector<1x1x1024xf32>
    %12 = arith.addf %9, %11 : vector<1x1x1024xf32>
    %c0_7 = arith.constant 0 : index
    %c0_8 = arith.constant 0 : index
    %c0_9 = arith.constant 0 : index
    %13 = vector.load %arg4[%c0_7, %c0_8, %c0_9] : memref<1x1x1024xf32, #tpu.memory_space<vmem>>, vector<1x1x1024xf32>
    tpu.vector_store %arg4[%c0_7, %c0_8, %c0_9], %12 {strides = array<i32>} : memref<1x1x1024xf32, #tpu.memory_space<vmem>>, vector<1x1x1024xf32>,
    %c0_10 = arith.constant 0 : index
    %c0_11 = arith.constant 0 : index
    %c0_12 = arith.constant 0 : index
    %14 = vector.load %arg5[%c0_10, %c0_11, %c0_12] : memref<1x1x1024xf32, #tpu.memory_space<vmem>>, vector<1x1x1024xf32>
    %cst_13 = arith.constant dense<0.000000e+00> : vector<1024xf32>
    %15 = vector.multi_reduction <add>, %6, %cst_13 [0] : vector<2x1024xf32> to vector<1024xf32>
    %16 = vector.shape_cast %15 : vector<1024xf32> to vector<1x1024xf32>
    %17 = vector.shape_cast %16 : vector<1x1024xf32> to vector<1x1x1024xf32>
    %18 = arith.addf %14, %17 : vector<1x1x1024xf32>
    %c0_14 = arith.constant 0 : index
    %c0_15 = arith.constant 0 : index
    %c0_16 = arith.constant 0 : index
    %19 = vector.load %arg5[%c0_14, %c0_15, %c0_16] : memref<1x1x1024xf32, #tpu.memory_space<vmem>>, vector<1x1x1024xf32>
    tpu.vector_store %arg5[%c0_14, %c0_15, %c0_16], %18 {strides = array<i32>} : memref<1x1x1024xf32, #tpu.memory_space<vmem>>, vector<1x1x1024xf32>,
    return
  }
  func.func @transform_0(%arg0: i32, %arg1: i32) -> (i32, i32) {
    %c1_i32 = arith.constant 1 : i32
    %0 = arith.muli %arg0, %c1_i32 : i32
    %1 = arith.addi %0, %arg1 : i32
    %c0_i32 = arith.constant 0 : i32
    %c0_i32_0 = arith.constant 0 : i32
    return %c0_i32, %1 : i32, i32
  }
  func.func @transform_1(%arg0: i32, %arg1: i32) -> (i32, i32) {
    %c1_i32 = arith.constant 1 : i32
    %0 = arith.muli %arg0, %c1_i32 : i32
    %1 = arith.addi %0, %arg1 : i32
    %c0_i32 = arith.constant 0 : i32
    %c0_i32_0 = arith.constant 0 : i32
    return %c0_i32, %1 : i32, i32
  }
  func.func @transform_2(%arg0: i32, %arg1: i32) -> (i32, i32, i32) {
    %c0_i32 = arith.constant 0 : i32
    %c0_i32_0 = arith.constant 0 : i32
    %c0_i32_1 = arith.constant 0 : i32
    return %arg0, %c0_i32, %c0_i32_0 : i32, i32, i32
  }
  func.func @transform_3(%arg0: i32, %arg1: i32) -> (i32, i32, i32) {
    %c0_i32 = arith.constant 0 : i32
    %c0_i32_0 = arith.constant 0 : i32
    %c0_i32_1 = arith.constant 0 : i32
    return %arg0, %c0_i32, %c0_i32_0 : i32, i32, i32
  }
}

</mosaic_0001>

<bundles_post_ra>
// kernel: tpu_custom_call.1
= control target key start
LH: loop header
LB: loop body
LE: loop exit
PB: predicated region body
PF: predicated region fallthrough
CT: control target
= control target key end

     0   :  { %9 = vsyncpa [#allocation3], 0  ;;  %s666_s0 = inlined_call_operand.hbm [shape: f32[2,1024], index: 0, kind: input, shape index: {}]   ;;  %s667_s1 = inlined_call_operand.hbm [shape: f32[2,1024], index: 1, kind: input, shape index: {}]   ;;  %s668_s2 = inlined_call_operand.hbm [shape: f32[1,1,1024], index: 2, kind: output, shape index: {0}]   ;;  %s669_s3 = inlined_call_operand.hbm [shape: f32[1,1,1024], index: 3, kind: output, shape index: {1}]  }
   0x1   :  { %10 = vsyncpa [#allocation6], 0 }
   0x2   :  { %11 = vsyncpa [#allocation4], 0 }
   0x3   :  { %12 = vsyncpa [#allocation9], 0  ;;  %s529_s12 = smov [#allocation2]   ;;  %s530_s14 = smov [#allocation5]  }
   0x4   :  { %s23_s13 = sshll.u32 %s529_s12, 4  ;;  %s37_s15 = sshll.u32 %s530_s14, 4  ;;  %s24_s13 = int_to_ptr.vmem [resolvable:$true] %s23_s13  ;;  %s38_s15 = int_to_ptr.vmem [resolvable:$true] %s37_s15 }
   0x5   :  { %s433_s18 = scalar_lea.hbm %s666_s0, 256 }
   0x6   :  { %p434_p0 = scmp.ne.s32.totalorder %s666_s0, %s433_s18  ;;  %p437_p1 = scmp.lt.u32.totalorder %s433_s18, %s666_s0 }
   0x8   :  { %p439_p2 = pnand %p437_p1, %p434_p0 }
   0xa   :  { %442 = shalt.err (!%p439_p2)
}
   0xb   :  { %s443_s23 = scalar_lea.vmem %s24_s13, 256  ;;  %p448_p4 = scmp.lt.s32.totalorder %s24_s13, %s24_s13 }
   0xc   :  { %p444_p3 = scmp.ne.s32.totalorder %s24_s13, %s443_s23  ;;  %p449_p5 = scmp.lt.s32.totalorder %s443_s23, %s443_s23 }
   0xe   :  { %p450_p6 = por %p449_p5, %p448_p4 }
  0x10   :  { %p451_p7 = pnand %p450_p6, %p444_p3 }
  0x12   :  { %454 = shalt.err (!%p451_p7)
}
  0x13   :  { %26 = dma.hbm_to_vmem [thread:$0]  %s666_s0, 256, %s24_s13, [#allocation3]  }
  0x14   :  { %s455_s28 = scalar_lea.hbm %s667_s1, 256 }
  0x15   :  { %p456_p8 = scmp.ne.s32.totalorder %s667_s1, %s455_s28  ;;  %p459_p9 = scmp.lt.u32.totalorder %s455_s28, %s667_s1 }
  0x17   :  { %p461_p10 = pnand %p459_p9, %p456_p8 }
  0x19   :  { %464 = shalt.err (!%p461_p10)
}
  0x1a   :  { %s465_s6 = scalar_lea.vmem %s38_s15, 256  ;;  %p470_p12 = scmp.lt.s32.totalorder %s38_s15, %s38_s15 }
  0x1b   :  { %p466_p11 = scmp.ne.s32.totalorder %s38_s15, %s465_s6  ;;  %p471_p13 = scmp.lt.s32.totalorder %s465_s6, %s465_s6 }
  0x1d   :  { %p472_p0 = por %p471_p13, %p470_p12 }
  0x1f   :  { %p473_p1 = pnand %p472_p0, %p466_p11 }
  0x21   :  { %476 = shalt.err (!%p473_p1)
}
  0x22   :  { %40 = dma.hbm_to_vmem [thread:$0]  %s667_s1, 256, %s38_s15, [#allocation6]  }
  0x23   :  { %521 = dma.done.wait [#allocation3], 256  }
  0x24   :  { %522 = vsyncadd [#allocation3], 4294967040 }
  0x25   :  { %523 = dma.done.wait [#allocation6], 256  }
  0x26   :  { %524 = vsyncadd [#allocation6], 4294967040  ;;  %v71_v0 = vlaneseq  ;;  %v531_v1 = vmov 1983009808   ;;  %v532_v4 = vmov 1966171168  }
  0x27   :  { %v69_v2 = vunpack.c.l.s4 %v531_v1  ;;  %v188_v5 = vunpack.c.l.s4 %v532_v4  ;;  %v57_v9 = vld [vmem:[#allocation2] sm:$0xff]  ;;  %v58_v10 = vld [vmem:[#allocation2 + $0x8] sm:$0xff]  ;;  %v59_v11 = vld [vmem:[#allocation5] sm:$0xff]  ;;  %vm109_vm0 = vcmask 1041408   ;;  %s533_s1 = smov [#allocation7]  }
  0x28   :  { %v72_v3 = vshrl.u32 %v71_v0, 7  ;;  %v60_v12 = vld [vmem:[#allocation5 + $0x8] sm:$0xff]  ;;  %v61_v13 = vsub.f32 %v59_v11, %v57_v9  ;;  %v63_v14 = vmul.f32 %v59_v11, %v59_v11  ;;  %s402_s8 = sshll.u32 %s533_s1, 4  ;;  %s403_s8 = int_to_ptr.vmem [resolvable:$true] %s402_s8 }
  0x29   :  { %v70_v6 = vunpack.c.0.s8 %v69_v2  ;;  %v189_v7 = vunpack.c.0.s8 %v188_v5  ;;  %v62_v15 = vsub.f32 %v60_v12, %v58_v10  ;;  %v583_v17 = vmul.f32 %v60_v12, %v60_v12  ;;  %s477_s9 = scalar_lea.vmem %s403_s8, 128  ;;  %p482_p3 = scmp.lt.s32.totalorder %s403_s8, %s403_s8 }
  0x2a   :  { %v67_v18 = vcombine.high %v61_v13, %v61_v13  ;;  %v238_v20 = vcombine.high %v63_v14, %v63_v14  ;;  %p478_p2 = scmp.ne.s32.totalorder %s403_s8, %s477_s9  ;;  %p483_p4 = scmp.lt.s32.totalorder %s477_s9, %s477_s9 }
  0x2b   :  { %v579_v8 = vsub.s32 %v70_v6, %v72_v3  ;;  %v581_v16 = vsub.s32 %v189_v7, %v72_v3  ;;  %v84_v22 = vcombine.high %v62_v15, %v62_v15  ;;  %v255_v24 = vcombine.high %v583_v17, %v583_v17 }
  0x2c   :  { %p484_p5 = por %p483_p4, %p482_p3 }
  0x2d   :  { %v74_v19 = vrot.slane %v61_v13, %v579_v8  ;;  %v587_v21 = vrot.slane %v63_v14, %v579_v8  ;;  %v91_v23 = vrot.slane %v62_v15, %v579_v8  ;;  %v594_v25 = vrot.slane %v583_v17, %v579_v8 }
  0x2e   :  { %v81_v26 = vrot.slane %v67_v18, %v579_v8  ;;  %v599_v29 = vrot.slane %v238_v20, %v579_v8  ;;  %v98_v30 = vrot.slane %v84_v22, %v579_v8  ;;  %p485_p6 = pnand %p484_p5, %p478_p2 }
  0x2f   :  { %v82_v27 = vcombine.high %v74_v19, %v74_v19  ;;  %v110_v28 = vsel %vm109_vm0, %v74_v19, 0.0  ;;  %v99_v31 = vcombine.high %v91_v23, %v91_v23  ;;  %v138_v33 = vsel %vm109_vm0, %v91_v23, 0.0 }
  0x30   :  { %v111_v32 = vrot.slane %v110_v28, 4  ;;  %v83_v34 = vcombine.high %v81_v26, %v81_v26  ;;  %v124_v36 = vsel %vm109_vm0, %v81_v26, 0.0  ;;  %v139_v37 = vrot.slane %v138_v33, 4 }
  0x31   :  { %v117_v35 = vsel %vm109_vm0, %v82_v27, 0.0  ;;  %v100_v38 = vcombine.high %v98_v30, %v98_v30  ;;  %v125_v41 = vrot.slane %v124_v36, 4  ;;  %v145_v44 = vsel %vm109_vm0, %v99_v31, 0.0 }
  0x32   :  { %v112_v39 = vadd.f32 %v111_v32, %v110_v28  ;;  %v118_v40 = vrot.slane %v117_v35, 4  ;;  %v131_v42 = vsel %vm109_vm0, %v83_v34, 0.0  ;;  %v140_v43 = vadd.f32 %v139_v37, %v138_v33 }
  0x33   :  { %v152_v45 = vsel %vm109_vm0, %v98_v30, 0.0  ;;  %v126_v48 = vadd.f32 %v125_v41, %v124_v36  ;;  %v132_v49 = vrot.slane %v131_v42, 4  ;;  %v146_v51 = vrot.slane %v145_v44, 4 }
  0x34   :  { %v113_v46 = vrot.slane %v112_v39, 2  ;;  %v119_v47 = vadd.f32 %v118_v40, %v117_v35  ;;  %v141_v50 = vrot.slane %v140_v43, 2  ;;  %v153_v52 = vrot.slane %v152_v45, 4 }
  0x35   :  { %v159_v53 = vsel %vm109_vm0, %v100_v38, 0.0  ;;  %v127_v56 = vrot.slane %v126_v48, 2  ;;  %v133_v57 = vadd.f32 %v132_v49, %v131_v42  ;;  %v147_v59 = vadd.f32 %v146_v51, %v145_v44 }
  0x36   :  { %v114_v54 = vadd.f32 %v113_v46, %v112_v39  ;;  %v120_v55 = vrot.slane %v119_v47, 2  ;;  %v142_v58 = vadd.f32 %v141_v50, %v140_v43  ;;  %v154_v60 = vadd.f32 %v153_v52, %v152_v45 }
  0x37   :  { %v160_v61 = vrot.slane %v159_v53, 4  ;;  %v128_v0 = vadd.f32 %v127_v56, %v126_v48  ;;  %v134_v1 = vrot.slane %v133_v57, 2  ;;  %v148_v3 = vrot.slane %v147_v59, 2 }
  0x38   :  { %v115_v62 = vrot.slane %v114_v54, 1  ;;  %v121_v63 = vadd.f32 %v120_v55, %v119_v47  ;;  %v143_v2 = vrot.slane %v142_v58, 1  ;;  %v155_v4 = vrot.slane %v154_v60, 2 }
  0x39   :  { %v161_v5 = vadd.f32 %v160_v61, %v159_v53  ;;  %v129_v9 = vrot.slane %v128_v0, 1  ;;  %v135_v10 = vadd.f32 %v134_v1, %v133_v57  ;;  %v149_v12 = vadd.f32 %v148_v3, %v147_v59 }
  0x3a   :  { %v116_v6 = vadd.f32 %v115_v62, %v114_v54  ;;  %v122_v7 = vrot.slane %v121_v63, 1  ;;  %v144_v11 = vadd.f32 %v143_v2, %v142_v58  ;;  %v156_v13 = vadd.f32 %v155_v4, %v154_v60 }
  0x3b   :  { %v162_v14 = vrot.slane %v161_v5, 2  ;;  %v130_v18 = vadd.f32 %v129_v9, %v128_v0  ;;  %v136_v19 = vrot.slane %v135_v10, 1  ;;  %v150_v22 = vrot.slane %v149_v12, 1 }
  0x3c   :  { %v123_v15 = vadd.f32 %v122_v7, %v121_v63  ;;  %v167_v20 = vmul.f32 %v116_v6, %v116_v6  ;;  %v157_v23 = vrot.slane %v156_v13, 1  ;;  %v171_v27 = vmul.f32 %v144_v11, %v144_v11 }
  0x3d   :  { %v163_v26 = vadd.f32 %v162_v14, %v161_v5  ;;  %v137_v28 = vadd.f32 %v136_v19, %v135_v10  ;;  %v169_v31 = vmul.f32 %v130_v18, %v130_v18  ;;  %v253_v32 = vcombine.high %v587_v21, %v587_v21 }
  0x3e   :  { %v168_v30 = vmul.f32 %v123_v15, %v123_v15  ;;  %v151_v33 = vadd.f32 %v150_v22, %v149_v12  ;;  %v158_v34 = vadd.f32 %v157_v23, %v156_v13  ;;  %v254_v36 = vcombine.high %v599_v29, %v599_v29 }
  0x3f   :  { %v164_v35 = vrot.slane %v163_v26, 1  ;;  %v170_v37 = vmul.f32 %v137_v28, %v137_v28  ;;  %v269_v39 = vrot.slane %v255_v24, %v579_v8  ;;  %v270_v40 = vcombine.high %v594_v25, %v594_v25 }
  0x40   :  { %v183_v38 = vcombine.low %v167_v20, %v168_v30  ;;  %v172_v42 = vmul.f32 %v151_v33, %v151_v33  ;;  %v173_v43 = vmul.f32 %v158_v34, %v158_v34  ;;  %v280_v44 = vsel %vm109_vm0, %v587_v21, 0.0 }
  0x41   :  { %v165_v41 = vadd.f32 %v164_v35, %v163_v26  ;;  %v184_v45 = vcombine.low %v169_v31, %v170_v37  ;;  %v271_v47 = vcombine.high %v269_v39, %v269_v39  ;;  %v281_v48 = vrot.slane %v280_v44, 4 }
  0x42   :  { %v193_v46 = vrot.slane %v183_v38, %v581_v16  ;;  %v185_v50 = vcombine.low %v171_v27, %v172_v42  ;;  %v287_v51 = vsel %vm109_vm0, %v253_v32, 0.0  ;;  %v294_v8 = vsel %vm109_vm0, %v599_v29, 0.0 }
  0x43   :  { %v174_v49 = vmul.f32 %v165_v41, %v165_v41  ;;  %v200_v17 = vrot.slane %v184_v45, %v581_v16  ;;  %v282_v24 = vadd.f32 %v281_v48, %v280_v44  ;;  %v288_v52 = vrot.slane %v287_v51, 4 }
  0x44   :  { %v295_v53 = vrot.slane %v294_v8, 4  ;;  %v207_v21 = vrot.slane %v185_v50, %v581_v16  ;;  %v301_v55 = vsel %vm109_vm0, %v254_v36, 0.0  ;;  %v308_v56 = vsel %vm109_vm0, %v594_v25, 0.0 }
  0x45   :  { %v186_v54 = vcombine.low %v173_v43, %v174_v49  ;;  %v215_v57 = vcombine.low %v193_v46, %v200_v17  ;;  %v283_v58 = vrot.slane %v282_v24, 2  ;;  %v289_v59 = vadd.f32 %v288_v52, %v287_v51 }
  0x46   :  { %v296_v60 = vadd.f32 %v295_v53, %v294_v8  ;;  %v302_v29 = vrot.slane %v301_v55, 4  ;;  %v309_v62 = vrot.slane %v308_v56, 4  ;;  %v315_v63 = vsel %vm109_vm0, %v270_v40, 0.0 }
  0x47   :  { %v214_v61 = vrot.slane %v186_v54, %v581_v16  ;;  %v223_v0 = vrot.slane %v215_v57, %v581_v16  ;;  %v284_v1 = vadd.f32 %v283_v58, %v282_v24  ;;  %v290_v2 = vrot.slane %v289_v59, 2 }
  0x48   :  { %v297_v3 = vrot.slane %v296_v60, 2  ;;  %v303_v5 = vadd.f32 %v302_v29, %v301_v55  ;;  %v310_v6 = vadd.f32 %v309_v62, %v308_v56  ;;  %v316_v7 = vrot.slane %v315_v63, 4 }
  0x49   :  { %v216_v4 = vcombine.low %v207_v21, %v214_v61  ;;  %v285_v25 = vrot.slane %v284_v1, 1  ;;  %v291_v9 = vadd.f32 %v290_v2, %v289_v59  ;;  %v322_v11 = vsel %vm109_vm0, %v269_v39, 0.0 }
  0x4a   :  { %v298_v10 = vadd.f32 %v297_v3, %v296_v60  ;;  %v304_v13 = vrot.slane %v303_v5, 2  ;;  %v311_v14 = vrot.slane %v310_v6, 2  ;;  %v317_v15 = vadd.f32 %v316_v7, %v315_v63 }
  0x4b   :  { %v230_v12 = vrot.slane %v216_v4, %v581_v16  ;;  %v292_v18 = vrot.slane %v291_v9, 1  ;;  %v323_v20 = vrot.slane %v322_v11, 4  ;;  %v286_v28 = vadd.f32 %v285_v25, %v284_v1 }
  0x4c   :  { %v299_v19 = vrot.slane %v298_v10, 1  ;;  %v305_v23 = vadd.f32 %v304_v13, %v303_v5  ;;  %v312_v26 = vadd.f32 %v311_v14, %v310_v6  ;;  %v318_v27 = vrot.slane %v317_v15, 2 }
  0x4d   :  { %v231_v22 = vcombine.low %v223_v0, %v230_v12  ;;  %v293_v30 = vadd.f32 %v292_v18, %v291_v9  ;;  %v324_v31 = vadd.f32 %v323_v20, %v322_v11  ;;  %v329_v32 = vsel %vm109_vm0, %v271_v47, 0.0 }
  0x4e   :  { %v306_v33 = vrot.slane %v305_v23, 1  ;;  %v313_v34 = vrot.slane %v312_v26, 1  ;;  %v319_v35 = vadd.f32 %v318_v27, %v317_v15  ;;  %v300_v36 = vadd.f32 %v299_v19, %v298_v10 }
  0x4f   :  { %v325_v37 = vrot.slane %v324_v31, 2  ;;  %v330_v38 = vrot.slane %v329_v32, 4  ;;  %234 = vst [vmem:[#allocation7] sm:$0xff] %v231_v22 }
  0x50   :  { %v307_v39 = vadd.f32 %v306_v33, %v305_v23  ;;  %v320_v40 = vrot.slane %v319_v35, 1 }
  0x51   :  { %v326_v41 = vadd.f32 %v325_v37, %v324_v31  ;;  %v331_v42 = vadd.f32 %v330_v38, %v329_v32 }
  0x52   :  { %488 = shalt.err (!%p485_p6)
}
  0x53   :  { %s489_s12 = scalar_lea.hbm %s668_s2, 128 }
  0x54   :  { %p490_p7 = scmp.ne.s32.totalorder %s668_s2, %s489_s12  ;;  %p493_p8 = scmp.lt.u32.totalorder %s489_s12, %s668_s2 }
  0x56   :  { %p495_p9 = pnand %p493_p8, %p490_p7 }
  0x58   :  { %498 = shalt.err (!%p495_p9)
}
  0x59   :  { %405 = dma.vmem_to_hbm [thread:$0]  %s403_s8, 128, %s668_s2, [#allocation4]   ;;  %v314_v43 = vadd.f32 %v313_v34, %v312_v26  ;;  %v344_v44 = vcombine.low %v286_v28, %v293_v30  ;;  %v321_v45 = vadd.f32 %v320_v40, %v319_v35  ;;  %v327_v46 = vrot.slane %v326_v41, 1 }
  0x5a   :  { %v332_v47 = vrot.slane %v331_v42, 2  ;;  %v345_v48 = vcombine.low %v300_v36, %v307_v39  ;;  %s534_s2 = smov [#allocation8]  }
  0x5b   :  { %v354_v50 = vrot.slane %v344_v44, %v581_v16  ;;  %v328_v51 = vadd.f32 %v327_v46, %v326_v41  ;;  %v346_v17 = vcombine.low %v314_v43, %v321_v45  ;;  %s412_s19 = sshll.u32 %s534_s2, 4  ;;  %s413_s19 = int_to_ptr.vmem [resolvable:$true] %s412_s19 }
  0x5c   :  { %v333_v49 = vadd.f32 %v332_v47, %v331_v42  ;;  %v361_v24 = vrot.slane %v345_v48, %v581_v16  ;;  %s499_s20 = scalar_lea.vmem %s413_s19, 128  ;;  %p504_p11 = scmp.lt.s32.totalorder %s413_s19, %s413_s19 }
  0x5d   :  { %v368_v54 = vrot.slane %v346_v17, %v581_v16  ;;  %p500_p10 = scmp.ne.s32.totalorder %s413_s19, %s499_s20  ;;  %p505_p12 = scmp.lt.s32.totalorder %s499_s20, %s499_s20 }
  0x5e   :  { %v334_v8 = vrot.slane %v333_v49, 1  ;;  %v376_v21 = vcombine.low %v354_v50, %v361_v24 }
  0x5f   :  { %p506_p13 = por %p505_p12, %p504_p11 }
  0x60   :  { %v335_v52 = vadd.f32 %v334_v8, %v333_v49  ;;  %v384_v57 = vrot.slane %v376_v21, %v581_v16 }
  0x61   :  { %p507_p0 = pnand %p506_p13, %p500_p10 }
  0x62   :  { %v347_v53 = vcombine.low %v328_v51, %v335_v52 }
  0x64   :  { %v375_v55 = vrot.slane %v347_v53, %v581_v16 }
  0x66   :  { %v377_v56 = vcombine.low %v368_v54, %v375_v55 }
  0x68   :  { %v391_v58 = vrot.slane %v377_v56, %v581_v16 }
  0x6a   :  { %v392_v59 = vcombine.low %v384_v57, %v391_v58 }
  0x6c   :  { %395 = vst [vmem:[#allocation8] sm:$0xff] %v392_v59 }
  0x6d   :  { %510 = shalt.err (!%p507_p0)
}
  0x6e   :  { %s511_s23 = scalar_lea.hbm %s669_s3, 128 }
  0x6f   :  { %p512_p1 = scmp.ne.s32.totalorder %s669_s3, %s511_s23  ;;  %p515_p2 = scmp.lt.u32.totalorder %s511_s23, %s669_s3 }
  0x71   :  { %p517_p3 = pnand %p515_p2, %p512_p1 }
  0x73   :  { %520 = shalt.err (!%p517_p3)
}
  0x74   :  { %415 = dma.vmem_to_hbm [thread:$0]  %s413_s19, 128, %s669_s3, [#allocation9]  }
  0x75   :  { %525 = dma.done.wait [#allocation4], 128  }
  0x76   :  { %526 = vsyncadd [#allocation4], 4294967168 }
  0x77   :  { %527 = dma.done.wait [#allocation9], 128  }
  0x78   :  { %528 = vsyncadd [#allocation9], 4294967168 }
  0x79   :  { %422 = vsyncpa [#allocation3], 1 }
  0x7a   :  { %423 = vsyncpa [#allocation6], 1 }
  0x7b   :  { %424 = vsyncpa [#allocation4], 1 }
  0x7c   :  { %425 = vsyncpa [#allocation9], 1 }

</bundles_post_ra>
